<compile_context>
chip_gen: v7x
topology: tpu7x:2x2x1
jax: 0.10.0
libtpu: 0.0.40
codegen_flags: <defaults>
</compile_context>

<pallas_src>
import functools
import math

import jax
import jax.numpy as jnp
from jax.experimental import pallas as pl
from jax.experimental.pallas import tpu as pltpu


# ----------------------------------------------------------------------------
# Kernels
# ----------------------------------------------------------------------------
def _qkv_proj_kernel(x_ref, w_ref, o_ref):
    # x_ref: (1, tn, C)   w_ref: (C, 3C) bf16 (q-scale pre-folded)   o_ref: (1, tn, 3C) bf16
    x = x_ref[0].astype(jnp.bfloat16)
    o_ref[0] = jnp.dot(x, w_ref[...],
                       preferred_element_type=jnp.float32).astype(o_ref.dtype)


def _flash_attn_kernel(q_ref, k_ref, v_ref, o_ref, m_sc, l_sc, acc_sc):
    # q_ref: (1, tq, D) bf16 (pre-scaled)   k_ref/v_ref: (1, tk, D) bf16
    # o_ref: (1, tq, D) bf16               scratch: m/l (tq,1) f32, acc (tq,D) f32
    ki = pl.program_id(2)

    @pl.when(ki == 0)
    def _():
        m_sc[...] = jnp.full_like(m_sc, -jnp.inf)
        l_sc[...] = jnp.zeros_like(l_sc)
        acc_sc[...] = jnp.zeros_like(acc_sc)

    q = q_ref[0]                                   # (tq, D) bf16
    k = k_ref[0]                                   # (tk, D) bf16
    s = jnp.dot(q, k.T, preferred_element_type=jnp.float32)   # (tq, tk) f32

    m_prev = m_sc[...]
    m_new = jnp.maximum(m_prev, jnp.max(s, axis=-1, keepdims=True))
    alpha = jnp.exp(m_prev - m_new)                # f32 softmax math (v5e-safe)
    p = jnp.exp(s - m_new)

    l_sc[...] = alpha * l_sc[...] + jnp.sum(p, axis=-1, keepdims=True)
    acc_sc[...] = alpha * acc_sc[...] + jnp.dot(
        p.astype(jnp.bfloat16), v_ref[0], preferred_element_type=jnp.float32)
    m_sc[...] = m_new

    @pl.when(ki == pl.num_programs(2) - 1)
    def _():
        inv_l = pl.reciprocal(l_sc[...], approx=True)
        o_ref[0] = (acc_sc[...] * inv_l).astype(o_ref.dtype)


def _out_proj_kernel(a_ref, w_ref, b_ref, o_ref):
    # a_ref: (1, tn, C) bf16   w_ref: (C, C) bf16   b_ref: (1, C) f32   o_ref: (1, tn, C)
    y = jnp.dot(a_ref[0], w_ref[...],
                preferred_element_type=jnp.float32) + b_ref[...]
    o_ref[0] = y.astype(o_ref.dtype)


# ----------------------------------------------------------------------------
# Parameter preparation (one-time, at load): torch nn.Linear layout -> kernel
# layout, bf16 weights, query scale folded into W_qkv's q columns.
# ----------------------------------------------------------------------------
def prepare_attention_params(w_qkv, w_proj, b_proj, num_heads):
    dim = w_proj.shape[0]
    head_dim = dim // num_heads
    scale = head_dim ** (-0.5)

    w_qkv_t = jnp.asarray(w_qkv, dtype=jnp.float32).T            # (C, 3C)
    w_qkv_t = w_qkv_t.at[:, :dim].multiply(scale)                # fold q scale
    return {
        "w_qkv": w_qkv_t.astype(jnp.bfloat16),                   # (C, 3C)
        "w_proj": jnp.asarray(w_proj, dtype=jnp.float32).T.astype(jnp.bfloat16),
        "b_proj": jnp.asarray(b_proj, dtype=jnp.float32).reshape(1, dim),
    }


# ----------------------------------------------------------------------------
# Forward pass
# ----------------------------------------------------------------------------
@functools.partial(jax.jit, static_argnums=(2,))
def attention_forward(x, params, num_heads):
    B, N, C = x.shape
    H = num_heads
    D = C // H

    # Tile sizes (sequence). Small demo shapes use the full extent; real DiT
    # shapes (N=1k-4k) get 256-wide tiles so VMEM stays O(tile*N_tile).
    tn = min(256, N)
    tq = min(256, N)
    tk = min(256, N)
    assert N % tn == 0 and N % tq == 0 and N % tk == 0, "seq must tile evenly"

    w_qkv, w_proj, b_proj = params["w_qkv"], params["w_proj"], params["b_proj"]

    # ---- 1) fused QKV projection (bf16 MXU operands, f32 accumulation) ----
    qkv = pl.pallas_call(
        _qkv_proj_kernel,
        out_shape=jax.ShapeDtypeStruct((B, N, 3 * C), jnp.bfloat16),
        grid_spec=pltpu.PrefetchScalarGridSpec(
            num_scalar_prefetch=0,
            grid=(B, N // tn),
            in_specs=[
                pl.BlockSpec((1, tn, C), lambda b, s: (b, s, 0)),
                pl.BlockSpec((C, 3 * C), lambda b, s: (0, 0)),
            ],
            out_specs=pl.BlockSpec((1, tn, 3 * C), lambda b, s: (b, s, 0)),
        ),
        compiler_params=pltpu.CompilerParams(
            dimension_semantics=("parallel", "parallel")),
    )(x, w_qkv)

    # ---- 2) head split (cheap XLA layout change, outside the kernels) ----
    qkv5 = jnp.transpose(qkv.reshape(B, N, 3, H, D), (2, 0, 3, 1, 4))  # (3,B,H,N,D)
    q = qkv5[0].reshape(B * H, N, D)   # already scaled by head_dim**-0.5
    k = qkv5[1].reshape(B * H, N, D)
    v = qkv5[2].reshape(B * H, N, D)

    # ---- 3) flash attention with online softmax ----
    attn = pl.pallas_call(
        _flash_attn_kernel,
        out_shape=jax.ShapeDtypeStruct((B * H, N, D), jnp.bfloat16),
        grid_spec=pltpu.PrefetchScalarGridSpec(
            num_scalar_prefetch=0,
            grid=(B * H, N // tq, N // tk),
            in_specs=[
                pl.BlockSpec((1, tq, D), lambda bh, qi, ki: (bh, qi, 0)),
                pl.BlockSpec((1, tk, D), lambda bh, qi, ki: (bh, ki, 0)),
                pl.BlockSpec((1, tk, D), lambda bh, qi, ki: (bh, ki, 0)),
            ],
            out_specs=pl.BlockSpec((1, tq, D), lambda bh, qi, ki: (bh, qi, 0)),
            scratch_shapes=[
                pltpu.VMEM((tq, 1), jnp.float32),   # running max m
                pltpu.VMEM((tq, 1), jnp.float32),   # running denom l
                pltpu.VMEM((tq, D), jnp.float32),   # output accumulator
            ],
        ),
        compiler_params=pltpu.CompilerParams(
            dimension_semantics=("parallel", "parallel", "arbitrary")),
    )(q, k, v)

    # ---- 4) merge heads back to (B, N, C) ----
    attn = jnp.transpose(attn.reshape(B, H, N, D), (0, 2, 1, 3)).reshape(B, N, C)

    # ---- 5) output projection + bias ----
    out = pl.pallas_call(
        _out_proj_kernel,
        out_shape=jax.ShapeDtypeStruct((B, N, C), x.dtype),
        grid_spec=pltpu.PrefetchScalarGridSpec(
            num_scalar_prefetch=0,
            grid=(B, N // tn),
            in_specs=[
                pl.BlockSpec((1, tn, C), lambda b, s: (b, s, 0)),
                pl.BlockSpec((C, C), lambda b, s: (0, 0)),
                pl.BlockSpec((1, C), lambda b, s: (0, 0)),
            ],
            out_specs=pl.BlockSpec((1, tn, C), lambda b, s: (b, s, 0)),
        ),
        compiler_params=pltpu.CompilerParams(
            dimension_semantics=("parallel", "parallel")),
    )(attn, w_proj, b_proj)

    return out


# ----------------------------------------------------------------------------
# Pure-JAX reference mirroring the PyTorch forward exactly (f32).
# ----------------------------------------------------------------------------
def attention_reference(x, w_qkv, w_proj, b_proj, num_heads):
    B, N, C = x.shape
    head_dim = C // num_heads
    scale = head_dim ** (-0.5)

    qkv = x @ w_qkv.T                                      # (B, N, 3C)
    qkv = qkv.reshape(B, N, 3, num_heads, head_dim)
    qkv = jnp.transpose(qkv, (2, 0, 3, 1, 4))              # (3, B, H, N, D)
    q, k, v = qkv[0], qkv[1], qkv[2]

    attn = (q * scale) @ jnp.swapaxes(k, -2, -1)           # (B, H, N, N)
    attn = jax.nn.softmax(attn, axis=-1)
    out = attn @ v                                         # (B, H, N, D)
    out = jnp.swapaxes(out, 1, 2).reshape(B, N, C)
    return out @ w_proj.T + b_proj


if __name__ == "__main__":
    # Small config consistent with the module: dim=32, num_heads=4 -> head_dim=8
    B, N, C = 2, 16, 32
    num_heads = 4

    key = jax.random.PRNGKey(0)
    kx, kqkv, kp, kpb = jax.random.split(key, 4)

    x = jax.random.normal(kx, (B, N, C), dtype=jnp.float32)

    bound = 1.0 / math.sqrt(C)
    w_qkv = jax.random.uniform(kqkv, (3 * C, C), jnp.float32, -bound, bound)
    w_proj = jax.random.uniform(kp, (C, C), jnp.float32, -bound, bound)
    b_proj = jax.random.uniform(kpb, (C,), jnp.float32, -bound, bound)

    params = prepare_attention_params(w_qkv, w_proj, b_proj, num_heads)

    out = attention_forward(x, params, num_heads)
    out = jax.block_until_ready(out)

    ref = attention_reference(x, w_qkv, w_proj, b_proj, num_heads)
    assert out.shape == (B, N, C)
    max_err = jnp.max(jnp.abs(out - ref))
    # bf16 MXU operands + approx reciprocal => relaxed (attention-kernel-level)
    # tolerance against the f32 reference.
    assert jnp.allclose(out, ref, atol=5e-2, rtol=5e-2), f"max abs err = {max_err}"

    print("KERNEL_OK")
</pallas_src>

<mosaic_0001>
module attributes {stable_mosaic.version = 11 : i64} {
  func.func @_qkv_proj_kernel(%arg0: i32, %arg1: i32, %arg2: memref<1x16x32xf32, #tpu.memory_space<vmem>>, %arg3: memref<32x96xbf16, #tpu.memory_space<vmem>>, %arg4: memref<1x16x96xbf16, #tpu.memory_space<vmem>>) attributes {dimension_semantics = [#tpu.dimension_semantics<parallel>, #tpu.dimension_semantics<parallel>], iteration_bounds = array<i64: 2, 1>, scalar_prefetch = 0 : i64, scratch_operands = 0 : i64, tpu.core_type = #tpu.core_type<tc>, window_params = [{transform_indices = @transform_0, window_bounds = array<i64: 1, 16, 32>}, {pipeline_mode = #tpu.pipeline_mode<synchronous>, transform_indices = @transform_1, window_bounds = array<i64: 32, 96>}, {transform_indices = @transform_2, window_bounds = array<i64: 1, 16, 96>}]} {
    %c0 = arith.constant 0 : index
    %c0_0 = arith.constant 0 : index
    %c0_1 = arith.constant 0 : index
    %0 = vector.load %arg2[%c0, %c0_0, %c0_1] : memref<1x16x32xf32, #tpu.memory_space<vmem>>, vector<1x16x32xf32>
    %1 = vector.shape_cast %0 : vector<1x16x32xf32> to vector<16x32xf32>
    %2 = arith.truncf %1 : vector<16x32xf32> to vector<16x32xbf16>
    %c0_2 = arith.constant 0 : index
    %c0_3 = arith.constant 0 : index
    %3 = vector.load %arg3[%c0_2, %c0_3] : memref<32x96xbf16, #tpu.memory_space<vmem>>, vector<32x96xbf16>
    %cst = arith.constant dense<0.000000e+00> : vector<16x96xf32>
    %4 = tpu.matmul %2, %3, %cst {dimension_numbers = #tpu.dot_dimension_numbers<[1], [0], [0], [1], [0, 0, 1, 1], [], []>} : vector<16x32xbf16>, vector<32x96xbf16>, vector<16x96xf32> -> vector<16x96xf32>
    %5 = arith.truncf %4 : vector<16x96xf32> to vector<16x96xbf16>
    %c0_4 = arith.constant 0 : index
    %c0_5 = arith.constant 0 : index
    %c0_6 = arith.constant 0 : index
    %6 = vector.load %arg4[%c0_4, %c0_5, %c0_6] : memref<1x16x96xbf16, #tpu.memory_space<vmem>>, vector<1x16x96xbf16>
    %7 = vector.shape_cast %6 : vector<1x16x96xbf16> to vector<16x96xbf16>
    %8 = vector.shape_cast %5 : vector<16x96xbf16> to vector<1x16x96xbf16>
    tpu.vector_store %arg4[%c0_4, %c0_5, %c0_6], %8 {strides = array<i32>} : memref<1x16x96xbf16, #tpu.memory_space<vmem>>, vector<1x16x96xbf16>,
    return
  }
  func.func @transform_0(%arg0: i32, %arg1: i32) -> (i32, i32, i32) {
    %c0_i32 = arith.constant 0 : i32
    %c0_i32_0 = arith.constant 0 : i32
    return %arg0, %arg1, %c0_i32 : i32, i32, i32
  }
  func.func @transform_1(%arg0: i32, %arg1: i32) -> (i32, i32) {
    %c0_i32 = arith.constant 0 : i32
    %c0_i32_0 = arith.constant 0 : i32
    %c0_i32_1 = arith.constant 0 : i32
    return %c0_i32, %c0_i32_0 : i32, i32
  }
  func.func @transform_2(%arg0: i32, %arg1: i32) -> (i32, i32, i32) {
    %c0_i32 = arith.constant 0 : i32
    %c0_i32_0 = arith.constant 0 : i32
    return %arg0, %arg1, %c0_i32 : i32, i32, i32
  }
}

module attributes {stable_mosaic.version = 11 : i64} {
  func.func @_flash_attn_kernel(%arg0: i32, %arg1: i32, %arg2: i32, %arg3: memref<1x16x8xbf16, #tpu.memory_space<vmem>>, %arg4: memref<1x16x8xbf16, #tpu.memory_space<vmem>>, %arg5: memref<1x16x8xbf16, #tpu.memory_space<vmem>>, %arg6: memref<1x16x8xbf16, #tpu.memory_space<vmem>>, %arg7: memref<16x1xf32, #tpu.memory_space<vmem>>, %arg8: memref<16x1xf32, #tpu.memory_space<vmem>>, %arg9: memref<16x8xf32, #tpu.memory_space<vmem>>) attributes {dimension_semantics = [#tpu.dimension_semantics<parallel>, #tpu.dimension_semantics<parallel>, #tpu.dimension_semantics<arbitrary>], iteration_bounds = array<i64: 8, 1, 1>, scalar_prefetch = 0 : i64, scratch_operands = 3 : i64, tpu.core_type = #tpu.core_type<tc>, window_params = [{transform_indices = @transform_0, window_bounds = array<i64: 1, 16, 8>}, {transform_indices = @transform_1, window_bounds = array<i64: 1, 16, 8>}, {transform_indices = @transform_2, window_bounds = array<i64: 1, 16, 8>}, {transform_indices = @transform_3, window_bounds = array<i64: 1, 16, 8>}]} {
    %c0_i32 = arith.constant 0 : i32
    %0 = arith.cmpi eq, %arg2, %c0_i32 : i32
    %1 = arith.extui %0 : i1 to i32
    %c0_i32_0 = arith.constant 0 : i32
    %2 = arith.cmpi ne, %1, %c0_i32_0 : i32
    scf.if %2 {
      %cst_26 = arith.constant 0xFF800000 : f32
      %37 = vector.broadcast %cst_26 : f32 to vector<16x1xf32>
      %c0_27 = arith.constant 0 : index
      %c0_28 = arith.constant 0 : index
      %38 = vector.load %arg7[%c0_27, %c0_28] : memref<16x1xf32, #tpu.memory_space<vmem>>, vector<16x1xf32>
      tpu.vector_store %arg7[%c0_27, %c0_28], %37 {strides = array<i32>} : memref<16x1xf32, #tpu.memory_space<vmem>>, vector<16x1xf32>,
      %cst_29 = arith.constant 0.000000e+00 : f32
      %39 = vector.broadcast %cst_29 : f32 to vector<16x1xf32>
      %c0_30 = arith.constant 0 : index
      %c0_31 = arith.constant 0 : index
      %40 = vector.load %arg8[%c0_30, %c0_31] : memref<16x1xf32, #tpu.memory_space<vmem>>, vector<16x1xf32>
      tpu.vector_store %arg8[%c0_30, %c0_31], %39 {strides = array<i32>} : memref<16x1xf32, #tpu.memory_space<vmem>>, vector<16x1xf32>,
      %cst_32 = arith.constant 0.000000e+00 : f32
      %41 = vector.broadcast %cst_32 : f32 to vector<16x8xf32>
      %c0_33 = arith.constant 0 : index
      %c0_34 = arith.constant 0 : index
      %42 = vector.load %arg9[%c0_33, %c0_34] : memref<16x8xf32, #tpu.memory_space<vmem>>, vector<16x8xf32>
      tpu.vector_store %arg9[%c0_33, %c0_34], %41 {strides = array<i32>} : memref<16x8xf32, #tpu.memory_space<vmem>>, vector<16x8xf32>,
    } else {
    }
    %c0 = arith.constant 0 : index
    %c0_1 = arith.constant 0 : index
    %c0_2 = arith.constant 0 : index
    %3 = vector.load %arg3[%c0, %c0_1, %c0_2] : memref<1x16x8xbf16, #tpu.memory_space<vmem>>, vector<1x16x8xbf16>
    %4 = vector.shape_cast %3 : vector<1x16x8xbf16> to vector<16x8xbf16>
    %c0_3 = arith.constant 0 : index
    %c0_4 = arith.constant 0 : index
    %c0_5 = arith.constant 0 : index
    %5 = vector.load %arg4[%c0_3, %c0_4, %c0_5] : memref<1x16x8xbf16, #tpu.memory_space<vmem>>, vector<1x16x8xbf16>
    %6 = vector.shape_cast %5 : vector<1x16x8xbf16> to vector<16x8xbf16>
    %7 = tpu.transpose %6, [1, 0] : vector<16x8xbf16> -> vector<8x16xbf16>
    %cst = arith.constant dense<0.000000e+00> : vector<16x16xf32>
    %8 = tpu.matmul %4, %7, %cst {dimension_numbers = #tpu.dot_dimension_numbers<[1], [0], [0], [1], [0, 0, 1, 1], [], []>} : vector<16x8xbf16>, vector<8x16xbf16>, vector<16x16xf32> -> vector<16x16xf32>
    %c0_6 = arith.constant 0 : index
    %c0_7 = arith.constant 0 : index
    %9 = vector.load %arg7[%c0_6, %c0_7] : memref<16x1xf32, #tpu.memory_space<vmem>>, vector<16x1xf32>
    %cst_8 = arith.constant dense<0xFF800000> : vector<16xf32>
    %10 = vector.multi_reduction <maximumf>, %8, %cst_8 [1] : vector<16x16xf32> to vector<16xf32>
    %11 = vector.shape_cast %10 : vector<16xf32> to vector<16x1xf32>
    %12 = arith.maximumf %9, %11 : vector<16x1xf32>
    %13 = arith.subf %9, %12 : vector<16x1xf32>
    %14 = math.exp %13 : vector<16x1xf32>
    %15 = vector.broadcast %12 : vector<16x1xf32> to vector<16x16xf32>
    %16 = arith.subf %8, %15 : vector<16x16xf32>
    %17 = math.exp %16 : vector<16x16xf32>
    %c0_9 = arith.constant 0 : index
    %c0_10 = arith.constant 0 : index
    %18 = vector.load %arg8[%c0_9, %c0_10] : memref<16x1xf32, #tpu.memory_space<vmem>>, vector<16x1xf32>
    %19 = arith.mulf %14, %18 : vector<16x1xf32>
    %cst_11 = arith.constant dense<0.000000e+00> : vector<16xf32>
    %20 = vector.multi_reduction <add>, %17, %cst_11 [1] : vector<16x16xf32> to vector<16xf32>
    %21 = vector.shape_cast %20 : vector<16xf32> to vector<16x1xf32>
    %22 = arith.addf %19, %21 : vector<16x1xf32>
    %c0_12 = arith.constant 0 : index
    %c0_13 = arith.constant 0 : index
    %23 = vector.load %arg8[%c0_12, %c0_13] : memref<16x1xf32, #tpu.memory_space<vmem>>, vector<16x1xf32>
    tpu.vector_store %arg8[%c0_12, %c0_13], %22 {strides = array<i32>} : memref<16x1xf32, #tpu.memory_space<vmem>>, vector<16x1xf32>,
    %c0_14 = arith.constant 0 : index
    %c0_15 = arith.constant 0 : index
    %24 = vector.load %arg9[%c0_14, %c0_15] : memref<16x8xf32, #tpu.memory_space<vmem>>, vector<16x8xf32>
    %25 = vector.broadcast %14 : vector<16x1xf32> to vector<16x8xf32>
    %26 = arith.mulf %25, %24 : vector<16x8xf32>
    %27 = arith.truncf %17 : vector<16x16xf32> to vector<16x16xbf16>
    %c0_16 = arith.constant 0 : index
    %c0_17 = arith.constant 0 : index
    %c0_18 = arith.constant 0 : index
    %28 = vector.load %arg5[%c0_16, %c0_17, %c0_18] : memref<1x16x8xbf16, #tpu.memory_space<vmem>>, vector<1x16x8xbf16>
    %29 = vector.shape_cast %28 : vector<1x16x8xbf16> to vector<16x8xbf16>
    %cst_19 = arith.constant dense<0.000000e+00> : vector<16x8xf32>
    %30 = tpu.matmul %27, %29, %cst_19 {dimension_numbers = #tpu.dot_dimension_numbers<[1], [0], [0], [1], [0, 0, 1, 1], [], []>} : vector<16x16xbf16>, vector<16x8xbf16>, vector<16x8xf32> -> vector<16x8xf32>
    %31 = arith.addf %26, %30 : vector<16x8xf32>
    %c0_20 = arith.constant 0 : index
    %c0_21 = arith.constant 0 : index
    %32 = vector.load %arg9[%c0_20, %c0_21] : memref<16x8xf32, #tpu.memory_space<vmem>>, vector<16x8xf32>
    tpu.vector_store %arg9[%c0_20, %c0_21], %31 {strides = array<i32>} : memref<16x8xf32, #tpu.memory_space<vmem>>, vector<16x8xf32>,
    %c0_22 = arith.constant 0 : index
    %c0_23 = arith.constant 0 : index
    %33 = vector.load %arg7[%c0_22, %c0_23] : memref<16x1xf32, #tpu.memory_space<vmem>>, vector<16x1xf32>
    tpu.vector_store %arg7[%c0_22, %c0_23], %12 {strides = array<i32>} : memref<16x1xf32, #tpu.memory_space<vmem>>, vector<16x1xf32>,
    %c0_i32_24 = arith.constant 0 : i32
    %34 = arith.cmpi eq, %arg2, %c0_i32_24 : i32
    %35 = arith.extui %34 : i1 to i32
    %c0_i32_25 = arith.constant 0 : i32
    %36 = arith.cmpi ne, %35, %c0_i32_25 : i32
    scf.if %36 {
      %c0_26 = arith.constant 0 : index
      %c0_27 = arith.constant 0 : index
      %37 = vector.load %arg8[%c0_26, %c0_27] : memref<16x1xf32, #tpu.memory_space<vmem>>, vector<16x1xf32>
      %38 = tpu.reciprocal %37 {approx = true} : vector<16x1xf32> -> vector<16x1xf32>
      %c0_28 = arith.constant 0 : index
      %c0_29 = arith.constant 0 : index
      %39 = vector.load %arg9[%c0_28, %c0_29] : memref<16x8xf32, #tpu.memory_space<vmem>>, vector<16x8xf32>
      %40 = vector.broadcast %38 : vector<16x1xf32> to vector<16x8xf32>
      %41 = arith.mulf %39, %40 : vector<16x8xf32>
      %42 = arith.truncf %41 : vector<16x8xf32> to vector<16x8xbf16>
      %c0_30 = arith.constant 0 : index
      %c0_31 = arith.constant 0 : index
      %c0_32 = arith.constant 0 : index
      %43 = vector.load %arg6[%c0_30, %c0_31, %c0_32] : memref<1x16x8xbf16, #tpu.memory_space<vmem>>, vector<1x16x8xbf16>
      %44 = vector.shape_cast %43 : vector<1x16x8xbf16> to vector<16x8xbf16>
      %45 = vector.shape_cast %42 : vector<16x8xbf16> to vector<1x16x8xbf16>
      tpu.vector_store %arg6[%c0_30, %c0_31, %c0_32], %45 {strides = array<i32>} : memref<1x16x8xbf16, #tpu.memory_space<vmem>>, vector<1x16x8xbf16>,
    } else {
    }
    return
  }
  func.func @transform_0(%arg0: i32, %arg1: i32, %arg2: i32) -> (i32, i32, i32) {
    %c0_i32 = arith.constant 0 : i32
    %c0_i32_0 = arith.constant 0 : i32
    return %arg0, %arg1, %c0_i32 : i32, i32, i32
  }
  func.func @transform_1(%arg0: i32, %arg1: i32, %arg2: i32) -> (i32, i32, i32) {
    %c0_i32 = arith.constant 0 : i32
    %c0_i32_0 = arith.constant 0 : i32
    return %arg0, %arg2, %c0_i32 : i32, i32, i32
  }
  func.func @transform_2(%arg0: i32, %arg1: i32, %arg2: i32) -> (i32, i32, i32) {
    %c0_i32 = arith.constant 0 : i32
    %c0_i32_0 = arith.constant 0 : i32
    return %arg0, %arg2, %c0_i32 : i32, i32, i32
  }
  func.func @transform_3(%arg0: i32, %arg1: i32, %arg2: i32) -> (i32, i32, i32) {
    %c0_i32 = arith.constant 0 : i32
    %c0_i32_0 = arith.constant 0 : i32
    return %arg0, %arg1, %c0_i32 : i32, i32, i32
  }
}

module attributes {stable_mosaic.version = 11 : i64} {
  func.func @_out_proj_kernel(%arg0: i32, %arg1: i32, %arg2: memref<1x16x32xbf16, #tpu.memory_space<vmem>>, %arg3: memref<32x32xbf16, #tpu.memory_space<vmem>>, %arg4: memref<1x32xf32, #tpu.memory_space<vmem>>, %arg5: memref<1x16x32xf32, #tpu.memory_space<vmem>>) attributes {dimension_semantics = [#tpu.dimension_semantics<parallel>, #tpu.dimension_semantics<parallel>], iteration_bounds = array<i64: 2, 1>, scalar_prefetch = 0 : i64, scratch_operands = 0 : i64, tpu.core_type = #tpu.core_type<tc>, window_params = [{transform_indices = @transform_0, window_bounds = array<i64: 1, 16, 32>}, {pipeline_mode = #tpu.pipeline_mode<synchronous>, transform_indices = @transform_1, window_bounds = array<i64: 32, 32>}, {pipeline_mode = #tpu.pipeline_mode<synchronous>, transform_indices = @transform_2, window_bounds = array<i64: 1, 32>}, {transform_indices = @transform_3, window_bounds = array<i64: 1, 16, 32>}]} {
    %c0 = arith.constant 0 : index
    %c0_0 = arith.constant 0 : index
    %c0_1 = arith.constant 0 : index
    %0 = vector.load %arg2[%c0, %c0_0, %c0_1] : memref<1x16x32xbf16, #tpu.memory_space<vmem>>, vector<1x16x32xbf16>
    %1 = vector.shape_cast %0 : vector<1x16x32xbf16> to vector<16x32xbf16>
    %c0_2 = arith.constant 0 : index
    %c0_3 = arith.constant 0 : index
    %2 = vector.load %arg3[%c0_2, %c0_3] : memref<32x32xbf16, #tpu.memory_space<vmem>>, vector<32x32xbf16>
    %cst = arith.constant dense<0.000000e+00> : vector<16x32xf32>
    %3 = tpu.matmul %1, %2, %cst {dimension_numbers = #tpu.dot_dimension_numbers<[1], [0], [0], [1], [0, 0, 1, 1], [], []>} : vector<16x32xbf16>, vector<32x32xbf16>, vector<16x32xf32> -> vector<16x32xf32>
    %c0_4 = arith.constant 0 : index
    %c0_5 = arith.constant 0 : index
    %4 = vector.load %arg4[%c0_4, %c0_5] : memref<1x32xf32, #tpu.memory_space<vmem>>, vector<1x32xf32>
    %5 = vector.broadcast %4 : vector<1x32xf32> to vector<16x32xf32>
    %6 = arith.addf %3, %5 : vector<16x32xf32>
    %c0_6 = arith.constant 0 : index
    %c0_7 = arith.constant 0 : index
    %c0_8 = arith.constant 0 : index
    %7 = vector.load %arg5[%c0_6, %c0_7, %c0_8] : memref<1x16x32xf32, #tpu.memory_space<vmem>>, vector<1x16x32xf32>
    %8 = vector.shape_cast %7 : vector<1x16x32xf32> to vector<16x32xf32>
    %9 = vector.shape_cast %6 : vector<16x32xf32> to vector<1x16x32xf32>
    tpu.vector_store %arg5[%c0_6, %c0_7, %c0_8], %9 {strides = array<i32>} : memref<1x16x32xf32, #tpu.memory_space<vmem>>, vector<1x16x32xf32>,
    return
  }
  func.func @transform_0(%arg0: i32, %arg1: i32) -> (i32, i32, i32) {
    %c0_i32 = arith.constant 0 : i32
    %c0_i32_0 = arith.constant 0 : i32
    return %arg0, %arg1, %c0_i32 : i32, i32, i32
  }
  func.func @transform_1(%arg0: i32, %arg1: i32) -> (i32, i32) {
    %c0_i32 = arith.constant 0 : i32
    %c0_i32_0 = arith.constant 0 : i32
    %c0_i32_1 = arith.constant 0 : i32
    return %c0_i32, %c0_i32_0 : i32, i32
  }
  func.func @transform_2(%arg0: i32, %arg1: i32) -> (i32, i32) {
    %c0_i32 = arith.constant 0 : i32
    %c0_i32_0 = arith.constant 0 : i32
    %c0_i32_1 = arith.constant 0 : i32
    return %c0_i32, %c0_i32_0 : i32, i32
  }
  func.func @transform_3(%arg0: i32, %arg1: i32) -> (i32, i32, i32) {
    %c0_i32 = arith.constant 0 : i32
    %c0_i32_0 = arith.constant 0 : i32
    return %arg0, %arg1, %c0_i32 : i32, i32, i32
  }
}

</mosaic_0001>

<bundles_post_ra>
// kernel: attention_forward.3
= control target key start
LH: loop header
LB: loop body
LE: loop exit
PB: predicated region body
PF: predicated region fallthrough
CT: control target
= control target key end

     0   :  { %7 = vsyncpa [#allocation3], 0  ;;  %s792_s0 = inlined_call_operand.hbm [shape: f32[2,16,32], index: 0, kind: input, shape index: {}]   ;;  %s793_s1 = inlined_call_operand.hbm [shape: bf16[32,96], index: 1, kind: input, shape index: {}]   ;;  %s794_s2 = inlined_call_operand.vmem [shape: bf16[2,16,96], index: 2, kind: output, shape index: {}]  }
   0x1   :  { %9 = vsyncpa [#allocation3 + $0x1], 0 }
   0x2   :  { %10 = vsyncpa [#allocation5], 0  ;;  %s634_s9 = smov 0   ;;  %s636_s10 = smov 0  }
   0x3   :  { %s638_s11 = smov 0   ;;  %s640_s12 = smov 0  }
   0x4   :  { %s642_s13 = smov 0   ;;  %s644_s14 = smov 0  }
   0x5 LB: > { %s388_s15 = sadd.s32 4294967295, %s609_s14   ;;  %p50_p0 = scmp.ne.s32.totalorder %s593_s10, %s589_s9  ;;  %s609_s14 = sphi %s644_s14, %s16_s14   ;;  %s605_s13 = sphi %s642_s13, %s811_s13   ;;  %s601_s12 = sphi %s640_s12, %s810_s12   ;;  %s597_s11 = sphi %s638_s11, %s809_s11   ;;  %s593_s10 = sphi %s636_s10, %s808_s10   ;;  %s589_s9 = sphi %s634_s9, %s807_s9  }
   0x6   : > { %p664_p1 = scmp.eq.s32.totalorder %s388_s15, 0  ;;  %p390_p2 = scmp.ge.s32.totalorder %s609_s14, 1 }
   0x7   : > { %p110_p3 = scmp.lt.s32.totalorder %s609_s14, 3  ;;  %s611_s19 = smov [#allocation4]  }
   0x8   : > { %s799_s16 = scalar_select %p664_p1, 1, 0 }
   0x9   : > { %p672_p4 = por %p664_p1, %p50_p0  ;;  %p676_p5 = pnand %p390_p2, %p110_p3 }
   0xa   : > { %s122_s20 = sshll.u32 %s611_s19, 4  ;;  %s28_s22 = sadd.s32 1, %s605_s13  ;;  %s123_s20 = int_to_ptr.vmem [resolvable:$true] %s122_s20 }
   0xb   : > { %s800_s17 = scalar_select %p672_p4, 1, 0 }
   0xc   : > { %s801_s18 = scalar_select %p676_p5, 1, 0 }
   0xd   : > { %p429_p6 = pneg %p676_p5  ;;  %s497_s25 = scalar_lea.hbm %s793_s1, 256 }
   0xe   : > { %p498_p8 = scmp.ne.s32.totalorder %s793_s1, %s497_s25  ;;  %p504_p12 = scmp.lt.u32.totalorder %s497_s25, %s793_s1 }
   0xf   : > { %p684_p7 = pnand %p429_p6, %p664_p1 }
  0x11   : > { %p499_p9 = pneg %p684_p7 }
  0x13   : > { %p500_p10 = pnand %p499_p9, %p498_p8 }
  0x15   : > { %p501_p11 = pneg %p500_p10 }
  0x17   : > { %p506_p13 = pnand %p504_p12, %p501_p11 }
  0x19   : > { %509 = shalt.err (!%p506_p13)
}
  0x1a   : > { %s510_s30 = scalar_lea.vmem %s123_s20, 256  ;;  %p518_p6 = scmp.lt.s32.totalorder %s123_s20, %s123_s20 }
  0x1b   : > { %p511_p0 = scmp.ne.s32.totalorder %s123_s20, %s510_s30  ;;  %p519_p1 = scmp.lt.s32.totalorder %s510_s30, %s510_s30 }
  0x1d   : > { %p513_p2 = pnand %p511_p0, %p499_p9  ;;  %p520_p4 = por %p519_p1, %p518_p6 }
  0x1f   : > { %p514_p3 = pneg %p513_p2 }
  0x21   : > { %p521_p5 = pnand %p520_p4, %p514_p3 }
  0x23   : > { %524 = shalt.err (!%p521_p5)
}
  0x24   : > { %s612_s3 = smov 64   ;;  %s613_s4 = smov 4  }
  0x25   : > { %432 = dma.hbm_to_vmem [thread:$0]  (!%p684_p7), %s793_s1, 256, %s123_s20, [#allocation5], %s612_s3, %s612_s3, %s613_s4  }
  0x26   : > { %p30_p1 = scmp.ge.s32.totalorder %s28_s22, 2  ;;  %s37_s7 = sadd.s32 1, %s597_s11 }
  0x27   : > { %p44_p4 = scmp.ne.s32.totalorder %s597_s11, %s593_s10  ;;  %p45_p5 = scmp.eq.s32.totalorder %s609_s14, 0 }
  0x28   : > { %s813_s22 = smov (%p30_p1, %s28_s22), 0  ;;  %p438_p9 = scmp.lt.s32.totalorder %s609_s14, 2 }
  0x29   : > { %p46_p8 = por %p45_p5, %p44_p4  ;;  %s32_s8 = ssub.s32 %s605_s13, %s813_s22 }
  0x2a   : > { %s136_s9 = sand.u32 1, %s597_s11   ;;  %p35_p10 = scmp.eq.s32.totalorder %s32_s8, 0 }
  0x2b   : > { %s393_s15 = sshll.u32 %s136_s9, 4  ;;  %s408_s19 = sshll.u32 %s605_s13, 8 }
  0x2c   : > { %s717_s23 = scalar_select %p35_p10, %s597_s11, %s37_s7  }
  0x2d   : > { %s722_s20 = scalar_lea.hbm %s792_s0, %s408_s19  ;;  %s140_s25 = scalar_lea.vmem [#allocation2], %s393_s15 }
  0x2e   : > { %s149_s26 = sshll.u32 %s140_s25, 4  ;;  %p724_p7 = pnand %p438_p9, %p46_p8  ;;  %s728_s26 = int_to_ptr.vmem [resolvable:$true] %s149_s26 }
  0x2f   : > { %s730_s28 = scalar_lea.sflag [#allocation3], %s136_s9  ;;  %s525_s29 = scalar_lea.hbm %s722_s20, 256 }
  0x30   : > { %p526_p11 = scmp.ne.s32.totalorder %s722_s20, %s525_s29  ;;  %p527_p12 = pneg %p724_p7 }
  0x31   : > { %s530_s4 = scalar_lea.hbm %s792_s0, 512  ;;  %p531_p2 = scmp.lt.u32.totalorder %s722_s20, %s792_s0 }
  0x32   : > { %p528_p13 = pnand %p527_p12, %p526_p11  ;;  %p532_p3 = scmp.lt.u32.totalorder %s530_s4, %s525_s29 }
  0x33   : > { %p534_p1 = scmp.lt.u32.totalorder %s525_s29, %s722_s20 }
  0x34   : > { %p529_p0 = pneg %p528_p13  ;;  %p533_p6 = por %p532_p3, %p531_p2 }
  0x36   : > { %p535_p4 = por %p534_p1, %p533_p6 }
  0x38   : > { %p536_p5 = pnand %p535_p4, %p529_p0 }
  0x3a   : > { %539 = shalt.err (!%p536_p5)
}
  0x3b   : > { %s540_s7 = scalar_lea.vmem %s728_s26, 256  ;;  %s614_s8 = smov [#allocation2]  }
  0x3c   : > { %p541_p8 = scmp.ne.s32.totalorder %s728_s26, %s540_s7  ;;  %s545_s9 = sshll.u32 %s614_s8, 4  ;;  %s546_s9 = int_to_ptr.vmem [resolvable:$false] %s545_s9 }
  0x3d   : > { %s547_s15 = scalar_lea.vmem %s546_s9, 512  ;;  %p548_p11 = scmp.lt.s32.totalorder %s728_s26, %s546_s9 }
  0x3e   : > { %p543_p9 = pnand %p541_p8, %p527_p12  ;;  %p549_p13 = scmp.lt.s32.totalorder %s547_s15, %s540_s7 }
  0x40   : > { %p544_p10 = pneg %p543_p9  ;;  %p550_p2 = por %p549_p13, %p548_p11 }
  0x42   : > { %p551_p3 = pnand %p550_p2, %p544_p10 }
  0x44   : > { %554 = shalt.err (!%p551_p3)
}
  0x45   : > { %s615_s19 = smov 128   ;;  %s616_s21 = smov 8  }
  0x46   : > { %436 = dma.hbm_to_vmem [thread:$0]  (!%p724_p7), %s722_s20, 256, %s728_s26, %s730_s28, %s615_s19, %s615_s19, %s616_s21  }
  0x47   : > { %p804_p12 = scmp.ne.s32.totalorder %s801_s18, 0 }
  0x48   : > { %s163_s24 = sand.u32 (!%p804_p12), 1, %s593_s10   ;;  %p805_p0 = scmp.ne.s32.totalorder (!%p804_p12), %s800_s17, 0 }
  0x49   : > { %161 = sbr.rel (%p804_p12) target bundleno = 310 (0x136), region = 28  ;;  %s397_s25 = sshll.u32 (!%p804_p12), %s163_s24, 4 }
  0x4a   : > { %s164_s29 = scalar_lea.sflag (!%p804_p12), [#allocation3], %s163_s24  ;;  %s167_s30 = scalar_lea.vmem (!%p804_p12), [#allocation2], %s397_s25 }
  0x50   : > { %580 = dma.done.wait (%p805_p0), %s164_s29, 256  }
  0x51   : > { %582 = vsyncadd (%p805_p0), %s164_s29, 4294967040  ;;  %p806_p6 = scmp.ne.s32.totalorder %s799_s16, 0 }
  0x53   : > { %584 = dma.done.wait (%p806_p6), [#allocation5], 256  }
  0x54   : > { %586 = vsyncadd (%p806_p6), [#allocation5], 4294967040  ;;  %v617_v0 = vmov 0.0   ;;  %vm618_vm0 = vmmov 0   ;;  %v495_v1 = vld [vmem:[#allocation4] sm:$0xff]   ;;  %v496_v2 = vld [vmem:[#allocation4 + $0x8] sm:$0xff]  }
  0x55   : > { %415 = vmatprep.subr.bf16.mxu0 %v617_v0  ;;  %419 = vmatprep.mubr.msk.bf16.mxu0 %vm618_vm0, %v617_v0  ;;  %v208_v3 = vld [vmem:[%s167_s30] sm:$0xff]  ;;  %v209_v4 = vld [vmem:[%s167_s30 + $0x8] sm:$0xff]  ;;  %vm227_vm1 = vcmask 261120   ;;  %p198_p7 = scmp.lt.s32.totalorder %s601_s12, 1  ;;  %vm280_vm2 = vcmask 781312  }
  0x56   : > { %416 = vmatpush3.bf16.msra.mxu0 %v495_v1  ;;  %v210_v5 = vpack.c.bf16 %v209_v4, %v208_v3 }
  0x57   : > { %417 = vmatprep.subr.bf16.mxu0 %v617_v0  ;;  %s815_s12 = smov (!%p198_p7, %s601_s12), 1 }
  0x58   : > { %s409_s16 = sshll.u32 %s815_s12, 3 }
  0x59   : > { %s205_s20 = scalar_lea.vmem %s794_s2, %s409_s16 }
  0x5a   : > { %418 = vmatpush3.bf16.msra.mxu0 %v496_v2 }
  0x5d   : > { %420 = vmatmul.mubr.msk.bf16.vlgmr.msra.gmra.mrb[0].mxu0 %vm227_vm1, %v210_v5 }
 0x130   : > { %v265_v6 = vpop.f32.mrb[0].mxu0 }
 0x131   : > { %v410_v7 = vpack.c.bf16 %v265_v6, %v265_v6  ;;  %v421_v8 = vpop.f32.mrb[1].mxu0 }
 0x132   : > { %v268_v9 = vpop.f32.mrb[2].mxu0 }
 0x133   : > { %281 = vst.msk [vmem:[%s205_s20] sm:$0xf] %vm280_vm2, %v410_v7  ;;  %v411_v10 = vpack.c.bf16 %v268_v9, %v268_v9  ;;  %v422_v11 = vpop.f32.mrb[3].mxu0 }
 0x135   : > { %282 = vst.msk [vmem:[%s205_s20 + $0x4] sm:$0xf] %vm280_vm2, %v411_v10 }
 0x136 PF: > { %s16_s14 = sadd.s32 1, %s609_s14   ;;  %s807_s9 = smov %s593_s10 }
 0x137   : > { %p13_p1 = scmp.ge.s32.totalorder %s16_s14, 4   ;;  %s808_s10 = smov %s597_s11 }
 0x138   : > { %s809_s11 = smov %s717_s23  ;;  %s810_s12 = smov %s605_s13 }
 0x139   : > { %s811_s13 = smov %s813_s22  ;;  %15 = sbr.rel (!%p13_p1) target bundleno = 5 (0x5), region = 72 }
 0x140   :  { %313 = vsyncpa [#allocation3], 1 }
 0x141   :  { %315 = vsyncpa [#allocation3 + $0x1], 1 }
 0x142   :  { %316 = vsyncpa [#allocation5], 1 }

// kernel: attention_forward.5
= control target key start
LH: loop header
LB: loop body
LE: loop exit
PB: predicated region body
PF: predicated region fallthrough
CT: control target
= control target key end

     0   :  { %8 = vsyncpa [#allocation3], 0  ;;  %s698_s0 = inlined_call_operand.vmem [shape: bf16[2,16,32], index: 0, kind: input, shape index: {}]   ;;  %s699_s1 = inlined_call_operand.vmem [shape: bf16[32,32], index: 1, kind: input, shape index: {}]   ;;  %s700_s2 = inlined_call_operand.vmem [shape: f32[1,32], index: 2, kind: input, shape index: {}]   ;;  %s701_s3 = inlined_call_operand.hbm [shape: f32[2,16,32], index: 3, kind: output, shape index: {}]  }
   0x1   :  { %10 = vsyncpa [#allocation3 + $0x1], 0  ;;  %s571_s12 = smov 0   ;;  %s573_s13 = smov 0  }
   0x2   :  { %s575_s14 = smov 0   ;;  %s577_s15 = smov 0  }
   0x3   :  { %s579_s16 = smov 0   ;;  %s581_s17 = smov 0  }
   0x4 LB: > { %s373_s18 = sadd.s32 4294967295, %s544_s17   ;;  %s374_s19 = sadd.s32 4294967294, %s544_s17   ;;  %s544_s17 = sphi %s581_s17, %s16_s17   ;;  %s540_s16 = sphi %s579_s16, %s708_s16   ;;  %s536_s15 = sphi %s577_s15, %s707_s15   ;;  %s532_s14 = sphi %s575_s14, %s706_s14   ;;  %s528_s13 = sphi %s573_s13, %s705_s13   ;;  %s524_s12 = sphi %s571_s12, %s704_s12  }
   0x5   : > { %s28_s20 = sadd.s32 1, %s540_s16  ;;  %s107_s21 = sadd.s32 1, %s532_s14 }
   0x6   : > { %p30_p0 = scmp.ge.s32.totalorder %s28_s20, 2  ;;  %p117_p1 = scmp.ne.s32.totalorder %s532_s14, %s528_s13 }
   0x7   : > { %p118_p2 = scmp.eq.s32.totalorder %s373_s18, 1  ;;  %p123_p3 = scmp.ne.s32.totalorder %s528_s13, %s524_s12 }
   0x8   : > { %s710_s20 = smov (%p30_p0, %s28_s20), 0  ;;  %p124_p5 = scmp.eq.s32.totalorder %s374_s19, 1 }
   0x9   : > { %p611_p4 = por %p118_p2, %p117_p1  ;;  %s102_s23 = ssub.s32 %s540_s16, %s710_s20 }
   0xa   : > { %p377_p6 = scmp.ge.s32.totalorder %s544_s17, 1  ;;  %p105_p7 = scmp.eq.s32.totalorder %s102_s23, 0 }
   0xb   : > { %p618_p8 = por %p124_p5, %p123_p3  ;;  %p161_p9 = scmp.lt.s32.totalorder %s544_s17, 3 }
   0xc   : > { %s624_s25 = scalar_select %p105_p7, %s532_s14, %s107_s21  }
   0xd   : > { %p162_p10 = pnand %p377_p6, %p161_p9 }
   0xe   : > { %v463_v0 = vld [vmem:[%s699_s1] sm:$0xff] (!%p162_p10)   ;;  %v546_v1 = vmov (!%p162_p10), 0.0   ;;  %v464_v2 = vld [vmem:[%s699_s1 + $0x8] sm:$0xff] (!%p162_p10)   ;;  %vm547_vm0 = vmmov (!%p162_p10), 0   ;;  %p190_p11 = scmp.lt.s32.totalorder (!%p162_p10), %s536_s15, 1  ;;  %vm231_vm1 = vcmask (!%p162_p10), 261120  }
   0xf   : > { %165 = sbr.rel (%p162_p10) target bundleno = 258 (0x102), region = 32  ;;  %396 = vmatprep.subr.bf16.mxu0 (!%p162_p10), %v546_v1  ;;  %400 = vmatprep.mubr.msk.bf16.mxu0 (!%p162_p10), %vm547_vm0, %v546_v1  ;;  %s186_s8 = sand.u32 (!%p162_p10), 1, %s528_s13   ;;  %v381_v4 = vld [vmem:[%s700_s2] ss:$0 sm:$0xff] (!%p162_p10) }
  0x10   : > { %397 = vmatpush3.bf16.msra.mxu0 (!%p162_p10), %v463_v0  ;;  %s378_s9 = sshll.u32 (!%p162_p10), %s186_s8, 4  ;;  %s392_s21 = sshll.u32 (!%p162_p10), %s536_s15, 8 }
  0x11   : > { %398 = vmatprep.subr.bf16.mxu0 (!%p162_p10), %v546_v1  ;;  %s188_s18 = scalar_lea.vmem (!%p162_p10), [#allocation2], %s378_s9  ;;  %s648_s27 = scalar_lea.hbm (!%p162_p10), %s701_s3, %s392_s21 }
  0x12   : > { %s294_s19 = sshll.u32 (!%p162_p10), %s188_s18, 4  ;;  %s548_s29 = smov (!%p162_p10), [#allocation2]   ;;  %s643_s19 = int_to_ptr.vmem [resolvable:$true] %s294_s19 }
  0x13   : > { %s466_s28 = scalar_lea.vmem (!%p162_p10), %s643_s19, 256 }
  0x14   : > { %399 = vmatpush3.bf16.msra.mxu0 (!%p162_p10), %v464_v2  ;;  %p467_p12 = scmp.ne.s32.totalorder (!%p162_p10), %s643_s19, %s466_s28 }
  0x16   : > { %s191_s30 = scalar_select %p190_p11, %s536_s15, 1 }
  0x17   : > { %s652_s15 = scalar_lea.sflag [#allocation3], %s186_s8  ;;  %p468_p13 = pnand %p467_p12, %p611_p4 }
  0x18   : > { %s391_s4 = sshll.u32 %s191_s30, 3  ;;  %s470_s30 = sshll.u32 %s548_s29, 4  ;;  %s471_s30 = int_to_ptr.vmem [resolvable:$false] %s470_s30 }
  0x19   : > { %s197_s7 = scalar_lea.vmem %s698_s0, %s391_s4  ;;  %p469_p0 = pneg %p468_p13 }
  0x1a   : > { %v465_v3 = vld [vmem:[%s197_s7] sm:$0xff]   ;;  %s472_s4 = scalar_lea.vmem %s471_s30, 512  ;;  %p473_p1 = scmp.lt.s32.totalorder %s643_s19, %s471_s30 }
  0x1b   : > { %401 = vmatmul.mubr.msk.bf16.vlgmr.msra.gmra.mrb[0].mxu0 %vm231_vm1, %v465_v3  ;;  %p474_p2 = scmp.lt.s32.totalorder %s472_s4, %s466_s28 }
  0x1d   : > { %p475_p3 = por %p474_p2, %p473_p1 }
  0x1f   : > { %p476_p5 = pnand %p475_p3, %p469_p0 }
  0xee   : > { %v269_v5 = vpop.f32.mrb[0].mxu0 }
  0xef   : > { %v270_v6 = vadd.f32 %v381_v4, %v269_v5  ;;  %v402_v7 = vpop.f32.mrb[1].mxu0 }
  0xf0   : > { %v272_v8 = vpop.f32.mrb[2].mxu0 }
  0xf1   : > { %276 = vst.msk [vmem:[%s188_s18] sm:$0xff] %vm231_vm1, %v270_v6  ;;  %v273_v9 = vadd.f32 %v381_v4, %v272_v8  ;;  %v403_v10 = vpop.f32.mrb[3].mxu0 }
  0xf3   : > { %277 = vst.msk [vmem:[%s188_s18 + $0x8] sm:$0xff] %vm231_vm1, %v273_v9 }
  0xf4   : > { %479 = shalt.err (!%p476_p5)
}
  0xf5   : > { %s480_s5 = scalar_lea.hbm %s648_s27, 256  ;;  %s484_s8 = scalar_lea.hbm %s701_s3, 512 }
  0xf6   : > { %p481_p6 = scmp.ne.s32.totalorder %s648_s27, %s480_s5  ;;  %p485_p10 = scmp.lt.u32.totalorder %s648_s27, %s701_s3 }
  0xf7   : > { %p486_p11 = scmp.lt.u32.totalorder %s484_s8, %s480_s5  ;;  %p488_p13 = scmp.lt.u32.totalorder %s480_s5, %s648_s27 }
  0xf8   : > { %p482_p7 = pnand %p481_p6, %p611_p4 }
  0xf9   : > { %p487_p12 = por %p486_p11, %p485_p10 }
  0xfa   : > { %p483_p9 = pneg %p482_p7 }
  0xfb   : > { %p489_p0 = por %p488_p13, %p487_p12 }
  0xfd   : > { %p490_p1 = pnand %p489_p0, %p483_p9 }
  0xff   : > { %493 = shalt.err (!%p490_p1)
}
 0x100   : > { %s549_s11 = smov 128   ;;  %s550_s18 = smov 8  }
 0x101   : > { %404 = dma.vmem_to_hbm [thread:$0]  (%p611_p4), %s643_s19, 256, %s648_s27, %s652_s15, %s549_s11, %s549_s11, %s550_s18  }
 0x102 PF: > { %p410_p2 = scmp.ge.s32.totalorder %s544_s17, 2  ;;  %s309_s21 = sand.u32 1, %s524_s12  }
 0x103   : > { %s310_s23 = scalar_lea.sflag [#allocation3], %s309_s21 }
 0x104   : > { %p407_p3 = pnand %p410_p2, %p618_p8 }
 0x106   : > { %519 = dma.done.wait (!%p407_p3), %s310_s23, 256  }
 0x107   : > { %521 = vsyncadd (!%p407_p3), %s310_s23, 4294967040  ;;  %s16_s17 = sadd.s32 1, %s544_s17   ;;  %s704_s12 = smov %s528_s13 }
 0x108   : > { %p13_p5 = scmp.ge.s32.totalorder %s16_s17, 4   ;;  %s705_s13 = smov %s532_s14 }
 0x109   : > { %s706_s14 = smov %s624_s25  ;;  %s707_s15 = smov %s540_s16 }
 0x10a   : > { %s708_s16 = smov %s710_s20  ;;  %15 = sbr.rel (!%p13_p5) target bundleno = 4 (0x4), region = 67 }
 0x111   :  { %315 = vsyncpa [#allocation3], 1 }
 0x112   :  { %317 = vsyncpa [#allocation3 + $0x1], 1 }

// kernel: attention_forward.4
= control target key start
LH: loop header
LB: loop body
LE: loop exit
PB: predicated region body
PF: predicated region fallthrough
CT: control target
= control target key end

     0   :  { %s780_s12 = smov 0   ;;  %s782_s13 = smov 0   ;;  %s844_s0 = inlined_call_operand.vmem [shape: bf16[8,16,8], index: 0, kind: input, shape index: {}]   ;;  %s845_s1 = inlined_call_operand.vmem [shape: bf16[8,16,8], index: 1, kind: input, shape index: {}]   ;;  %s846_s2 = inlined_call_operand.vmem [shape: bf16[8,16,8], index: 2, kind: input, shape index: {}]   ;;  %s847_s3 = inlined_call_operand.vmem [shape: bf16[8,16,8], index: 3, kind: output, shape index: {}]  }
   0x1   :  { %s784_s14 = smov 0  }
   0x2 LB: > { %s32_s15 = sadd.s32 1, %s750_s13  ;;  %p647_p0 = scmp.ge.s32.totalorder %s754_s14, 1  ;;  %s754_s14 = sphi %s784_s14, %s13_s14   ;;  %s750_s13 = sphi %s782_s13, %s849_s13   ;;  %s746_s12 = sphi %s780_s12, %s848_s12  }
   0x3   : > { %p34_p1 = scmp.ge.s32.totalorder %s32_s15, 8  ;;  %p199_p2 = scmp.lt.s32.totalorder %s754_s14, 9 }
   0x5   : > { %s851_s15 = smov (%p34_p1, %s32_s15), 0  ;;  %p200_p3 = pnand %p647_p0, %p199_p2 }
   0x6   : > { %p250_p4 = scmp.lt.s32.totalorder (!%p200_p3), %s746_s12, 7  ;;  %vm299_vm0 = vcmask (!%p200_p3), 64512   ;;  %v756_v0 = vmov (!%p200_p3), 0.0   ;;  %vm757_vm1 = vmmov (!%p200_p3), 0   ;;  %vm294_vm2 = vcmask (!%p200_p3), 7168  }
   0x7   : > { %203 = sbr.rel (%p200_p3) target bundleno = 827 (0x33b), region = 32  ;;  %675 = vmatprep.subr.bf16.mxu0 (!%p200_p3), %v756_v0  ;;  %300 = vst.msk [vmem:[#allocation4] sm:$0xff] (!%p200_p3), %vm299_vm0, %v756_v0  ;;  %301 = vst.msk [vmem:[#allocation4 + $0x8] sm:$0xff] (!%p200_p3), %vm299_vm0, %v756_v0  ;;  %677 = vmatprep.mubr.msk.bf16.mxu0 (!%p200_p3), %vm757_vm1, %v756_v0  ;;  %v758_v4 = vmov (!%p200_p3), -inf   ;;  %vm366_vm3 = vcmask (!%p200_p3), 130048   ;;  %v759_v11 = vmov (!%p200_p3), 0  }
   0x8   : > { %681 = vmatprep.subr.bf16.mxu1 (!%p200_p3), %v756_v0  ;;  %683 = vmatprep.mubr.msk.bf16.mxu1 (!%p200_p3), %vm757_vm1, %v756_v0  ;;  %295 = vst.msk [vmem:[#allocation2] sm:$0xff] (!%p200_p3), %vm294_vm2, %v758_v4  ;;  %296 = vst.msk [vmem:[#allocation2 + $0x8] sm:$0xff] (!%p200_p3), %vm294_vm2, %v758_v4  ;;  %vm514_vm4 = vcmask (!%p200_p3), 60416  }
   0x9   : > { %297 = vst.msk [vmem:[#allocation3] sm:$0xff] (!%p200_p3), %vm294_vm2, %v756_v0  ;;  %298 = vst.msk [vmem:[#allocation3 + $0x8] sm:$0xff] (!%p200_p3), %vm294_vm2, %v756_v0  ;;  %715 = vset.pattern.permute.xlu1 (!%p200_p3), %v759_v11  ;;  %716 = vset.pattern.permute.xlu0 (!%p200_p3), %v759_v11 }
   0xe   : > { %s853_s12 = smov (!%p250_p4, %s746_s12), 7  ;;  %v412_v48 = vld [vmem:[#allocation4] sm:$0xff]  ;;  %v413_v50 = vld [vmem:[#allocation4 + $0x8] sm:$0xff] }
   0xf   : > { %s800_s16 = sshll.u32 %s853_s12, 3  ;;  %v364_v12 = vld [vmem:[#allocation2] sm:$0xff]  ;;  %v365_v15 = vld [vmem:[#allocation2 + $0x8] sm:$0xff] }
  0x10   : > { %s267_s19 = scalar_lea.vmem %s845_s1, %s800_s16  ;;  %s257_s22 = scalar_lea.vmem %s844_s0, %s800_s16  ;;  %v397_v36 = vld [vmem:[#allocation3] sm:$0xff]  ;;  %v398_v39 = vld [vmem:[#allocation3 + $0x8] sm:$0xff] }
  0x11   : > { %v717_v1 = vld [vmem:[%s267_s19] sm:$0xff]   ;;  %s277_s25 = scalar_lea.vmem %s846_s2, %s800_s16  ;;  %s287_s28 = scalar_lea.vmem %s847_s3, %s800_s16 }
  0x12   : > { %v321_v2 = vsel %vm299_vm0, %v717_v1, 0  ;;  %v718_v3 = vld [vmem:[%s257_s22] sm:$0xff]  }
  0x13   : > { %676 = vmatpush3.bf16.xpose.msra.mxu0 %v321_v2  ;;  %v719_v20 = vld [vmem:[%s277_s25] sm:$0xff]  }
  0x14   : > { %682 = vmatpush3.bf16.msra.mxu1 %v719_v20 }
  0x1a   : > { %678 = vmatmul.mubr.msk.bf16.vlgmr.msra.gmra.mrb[0].mxu0 %vm299_vm0, %v718_v3 }
  0xed   : > { %v357_v5 = vpop.f32.mrb[0].mxu0 }
  0xee   : > { %v679_v6 = vpop.f32.mrb[1].mxu0  ;;  %v367_v7 = vsel %vm366_vm3, %v357_v5, -inf }
  0xef   : > { %368 = vmax.xlane.f32.xlu0 %v367_v7  ;;  %v360_v8 = vpop.f32.mrb[2].mxu0 }
  0xf0   : > { %v680_v9 = vpop.f32.mrb[3].mxu0  ;;  %v370_v10 = vsel %vm366_vm3, %v360_v8, -inf }
  0xf3   : > { %371 = vmax.xlane.f32.xlu0 %v370_v10 }
 0x17c   : > { %v369_v13 = vpop.xlane.xlu0 %368 }
 0x17d   : > { %v373_v14 = vmax.f32 %v364_v12, %v369_v13 }
 0x17f   : > { %v375_v16 = vsub.f32 %v364_v12, %v373_v14  ;;  %483 = vst.msk [vmem:[#allocation2] sm:$0xff] %vm294_vm2, %v373_v14  ;;  %383 = vperm.xlu1 %715, %v373_v14  }
 0x180   : > { %v372_v17 = vpop.xlane.xlu0 %371 }
 0x181   : > { %v374_v18 = vmax.f32 %v365_v15, %v372_v17  ;;  %v377_v33 = vmul.f32 1.442695, %v375_v16 }
 0x183   : > { %v376_v19 = vsub.f32 %v365_v15, %v374_v18  ;;  %484 = vst.msk [vmem:[#allocation2 + $0x8] sm:$0xff] %vm294_vm2, %v374_v18  ;;  %388 = vperm.xlu1 %715, %v374_v18  }
 0x185   : > { %v379_v32 = vmul.f32 1.442695, %v376_v19 }
 0x1fe   : > { %v384_v21 = vpop.permute.xlu1 %383 }
 0x1ff   : > { %v391_v22 = vsub.f32 %v357_v5, %v384_v21 }
 0x201   : > { %v393_v23 = vmul.f32 1.442695, %v391_v22 }
 0x202   : > { %v389_v24 = vpop.permute.xlu1 %388 }
 0x203   : > { %720 = vpow2.f32 %v393_v23  ;;  %v392_v25 = vsub.f32 %v360_v8, %v389_v24 }
 0x205   : > { %v395_v26 = vmul.f32 1.442695, %v392_v25 }
 0x207   : > { %722 = vpow2.f32 %v395_v26 }
 0x208   : > { %724 = vpow2.f32 %v379_v32 }
 0x209   : > { %726 = vpow2.f32 %v377_v33 }
 0x20d   : > { %v721_v27 = vpop.eup %720 }
 0x20e   : > { %v401_v28 = vsel %vm366_vm3, %v721_v27, 0.0 }
 0x20f   : > { %402 = vadd.xlane.f32.xlu0 %v401_v28 }
 0x211   : > { %v723_v29 = vpop.eup %722 }
 0x212   : > { %v404_v30 = vsel %vm366_vm3, %v723_v29, 0.0  ;;  %v426_v31 = vpack.c.bf16 %v723_v29, %v721_v27  ;;  %v725_v34 = vpop.eup %724 }
 0x213   : > { %405 = vadd.xlane.f32.xlu1 %v404_v30  ;;  %v727_v35 = vpop.eup %726  ;;  %v400_v41 = vmul.f32 %v725_v34, %v398_v39 }
 0x214   : > { %684 = vmatmul.mubr.msk.bf16.vlgmr.msra.gmra.mrb[0].mxu1 %vm366_vm3, %v426_v31  ;;  %v399_v37 = vmul.f32 %v727_v35, %v397_v36 }
 0x224   : > { %421 = vperm.xlu1 %715, %v725_v34  }
 0x225   : > { %416 = vperm.xlu0 %716, %v727_v35  }
 0x29c   : > { %v403_v38 = vpop.xlane.xlu0 %402 }
 0x29d   : > { %v407_v40 = vadd.f32 %v403_v38, %v399_v37 }
 0x29f   : > { %410 = vst.msk [vmem:[#allocation3] sm:$0xff] %vm294_vm2, %v407_v40 }
 0x2a0   : > { %v406_v42 = vpop.xlane.xlu1 %405 }
 0x2a1   : > { %v408_v43 = vadd.f32 %v406_v42, %v400_v41 }
 0x2a3   : > { %411 = vst.msk [vmem:[#allocation3 + $0x8] sm:$0xff] %vm294_vm2, %v408_v43 }
 0x2a4   : > { %v417_v49 = vpop.permute.xlu0 %416  ;;  %v422_v51 = vpop.permute.xlu1 %421 }
 0x2a5   : > { %v424_v52 = vmul.f32 %v417_v49, %v412_v48  ;;  %v425_v54 = vmul.f32 %v422_v51, %v413_v50 }
 0x2a6   : > { %v488_v44 = vld [vmem:[#allocation3] sm:$0xff] }
 0x2a7   : > { %728 = vrcp.f32 %v488_v44 }
 0x2aa   : > { %v489_v45 = vld [vmem:[#allocation3 + $0x8] sm:$0xff] }
 0x2ab   : > { %730 = vrcp.f32 %v489_v45 }
 0x2b1   : > { %v729_v46 = vpop.eup %728 }
 0x2b2   : > { %496 = vperm.xlu0 %716, %v729_v46  }
 0x2b5   : > { %v731_v47 = vpop.eup %730 }
 0x2b6   : > { %501 = vperm.xlu0 %716, %v731_v47  }
 0x2e7   : > { %v472_v53 = vpop.f32.mrb[0].mxu1 }
 0x2e8   : > { %v479_v55 = vadd.f32 %v472_v53, %v424_v52  ;;  %v685_v56 = vpop.f32.mrb[1].mxu1 }
 0x2e9   : > { %v475_v57 = vpop.f32.mrb[2].mxu1 }
 0x2ea   : > { %481 = vst.msk [vmem:[#allocation4] sm:$0xff] %vm299_vm0, %v479_v55  ;;  %v480_v58 = vadd.f32 %v475_v57, %v425_v54  ;;  %v686_v59 = vpop.f32.mrb[3].mxu1 }
 0x2ec   : > { %482 = vst.msk [vmem:[#allocation4 + $0x8] sm:$0xff] %vm299_vm0, %v480_v58 }
 0x2f1   : > { %v492_v60 = vld [vmem:[#allocation4] sm:$0xff] }
 0x2f3   : > { %v493_v0 = vld [vmem:[#allocation4 + $0x8] sm:$0xff] }
 0x331   : > { %v497_v61 = vpop.permute.xlu0 %496 }
 0x332   : > { %v504_v62 = vmul.f32 %v497_v61, %v492_v60 }
 0x334   : > { %v669_v63 = vpack.c.bf16 %v504_v62, %v504_v62 }
 0x335   : > { %v502_v1 = vpop.permute.xlu0 %501 }
 0x336   : > { %515 = vst.msk [vmem:[%s287_s28] sm:$0xf] %vm514_vm4, %v669_v63  ;;  %v505_v2 = vmul.f32 %v502_v1, %v493_v0 }
 0x338   : > { %v670_v3 = vpack.c.bf16 %v505_v2, %v505_v2 }
 0x33a   : > { %516 = vst.msk [vmem:[%s287_s28 + $0x4] sm:$0xf] %vm514_vm4, %v670_v3 }
 0x33b PF: > { %s13_s14 = sadd.s32 1, %s754_s14   ;;  %s848_s12 = smov %s750_s13 }
 0x33c   : > { %p10_p5 = scmp.ge.s32.totalorder %s13_s14, 10   ;;  %s849_s13 = smov %s851_s15 }
 0x33e   :  { %12 = sbr.rel (!%p10_p5) target bundleno = 2 (0x2), region = 76 }

</bundles_post_ra>
